<compile_context>
chip_gen: v5e
topology: v5e:2x2
jax: 0.10.0
libtpu: 0.0.40
codegen_flags: <defaults>
</compile_context>

<pallas_src>
import jax
import jax.numpy as jnp
from jax.experimental import pallas as pl
from jax.experimental.pallas import tpu as pltpu

HIDDEN = 32            # hidden_dim
OUTPUT = 4             # output_dim
H2 = HIDDEN // 2       # readout hidden dims
H4 = HIDDEN // 4
PAD = 128              # lane-dense padded readout width
NUM_NODES = 16         # nodes per graph batch
NUM_EDGES = 32         # edges per graph batch
NUM_GRAPHS = 2         # graphs per graph batch
NUM_BATCH = 4          # graph batches total
NUM_ATOM_FEATS = 9     # OGB atom features: 9 categorical columns
ATOM_VOCAB = 16
LEAKY_SLOPE = 0.2

NUM_STEPS = 2                       # grid extent; 2 -> one step per TC on v7x
BPS = NUM_BATCH // NUM_STEPS        # graph-batches fused (sublane-stacked) per step
NS = BPS * NUM_NODES                # nodes per step (block-diagonal fused)
ROWS = NS                           # pooled rows per step (padded to NS sublanes)
REAL_ROWS = BPS * NUM_GRAPHS        # real pooled rows per step


# ------------------------------ Pallas kernel ------------------------------ #
def _sir_kernel(slab_ref, wc_ref, w1_ref, w2_ref, w3_ref, bias_ref, out_ref):
    # Packed per-step slab (bf16), sublane-stacked so slices are cheap
    # sublane-offset loads (no lane rotation):
    #   rows [0,NS)      : h0        [NS, H]
    #   rows [NS,2NS)    : Ahat = I + A, block-diagonal across the fused batches
    #   rows [2NS,3NS)   : pooling membership, rows >= REAL_ROWS are zero
    h0 = slab_ref[0, 0:NS, :]                 # [NS, H]   bf16
    ahat = slab_ref[0, NS:2 * NS, :]          # [NS, NS]  bf16
    pool = slab_ref[0, 2 * NS:3 * NS, :]      # [ROWS, NS] bf16
    b = bias_ref[...]                         # [8, PAD] f32 packed biases

    # SIRConv (agg_type='sum', eps=0 baked): self + neighbor sum fused as one
    # adjacency matmul, then the conv Linear; norm='none', LeakyReLU(0.2).
    agg = jnp.dot(ahat, h0, preferred_element_type=jnp.float32)            # [NS,H]
    h1 = jnp.dot(agg.astype(jnp.bfloat16), wc_ref[...],
                 preferred_element_type=jnp.float32) + b[0:1, :HIDDEN]
    h1 = jnp.maximum(h1, LEAKY_SLOPE * h1)

    # SumPooling per graph (padded rows are zero and only produce discarded
    # garbage rows in the output slab).
    g = jnp.dot(pool, h1.astype(jnp.bfloat16),
                preferred_element_type=jnp.float32)                        # [ROWS,H]

    # Readout MLP (BatchNorm folded in wrapper); widths zero-padded to 128
    # lanes so every intermediate and the final store are unmasked/lane-dense.
    r1 = jnp.dot(g.astype(jnp.bfloat16), w1_ref[...],
                 preferred_element_type=jnp.float32) + b[1:2, :]
    r1 = jnp.maximum(r1, LEAKY_SLOPE * r1)
    r2 = jnp.dot(r1.astype(jnp.bfloat16), w2_ref[...],
                 preferred_element_type=jnp.float32) + b[2:3, :]
    r2 = jnp.maximum(r2, LEAKY_SLOPE * r2)
    out = jnp.dot(r2.astype(jnp.bfloat16), w3_ref[...],
                  preferred_element_type=jnp.float32) + b[3:4, :]
    out_ref[0] = out                                                       # [ROWS,PAD]


def sir_forward_pallas(slab, wc, w1, w2, w3, biases):
    S = slab.shape[0]

    def const2d(shape):
        return pl.BlockSpec(shape, lambda s: (0, 0))

    out = pl.pallas_call(
        _sir_kernel,
        out_shape=jax.ShapeDtypeStruct((S, ROWS, PAD), jnp.float32),
        grid=(S,),
        in_specs=[pl.BlockSpec((1, 3 * NS, NS), lambda s: (s, 0, 0)),   # packed slab
                  const2d((HIDDEN, HIDDEN)),
                  const2d((HIDDEN, PAD)),
                  const2d((PAD, PAD)),
                  const2d((PAD, PAD)),
                  const2d((8, PAD))],
        out_specs=pl.BlockSpec((1, ROWS, PAD), lambda s: (s, 0, 0)),
        compiler_params=pltpu.CompilerParams(
            dimension_semantics=("parallel",)),
    )(slab, wc, w1, w2, w3, biases)
    # lane-dense padded slab -> real [B, G, O] result
    return out[:, :REAL_ROWS, :OUTPUT].reshape(NUM_BATCH, NUM_GRAPHS, OUTPUT)


# ---------------------------------- main ----------------------------------- #
if __name__ == "__main__":
    key = jax.random.PRNGKey(0)
    ks = list(jax.random.split(key, 24))

    B, N, E, G = NUM_BATCH, NUM_NODES, NUM_EDGES, NUM_GRAPHS
    n_per_g = N // G
    e_per_g = E // G

    # ---- synthetic batched graphs: B batches, each G graphs of n_per_g nodes ----
    nfeats = jax.random.randint(ks[0], (B, N, NUM_ATOM_FEATS), 0, ATOM_VOCAB,
                                dtype=jnp.int32)
    src_local = jax.random.randint(ks[1], (B, G, e_per_g), 0, n_per_g, dtype=jnp.int32)
    dst_local = jax.random.randint(ks[2], (B, G, e_per_g), 0, n_per_g, dtype=jnp.int32)
    offs = (jnp.arange(G, dtype=jnp.int32) * n_per_g)[None, :, None]
    src = (src_local + offs).reshape(B, E)
    dst = (dst_local + offs).reshape(B, E)
    graph_id = jnp.repeat(jnp.arange(G, dtype=jnp.int32), n_per_g)          # [N]

    # ---- AtomEncoder (embedding gathers, plain-JAX glue) ----
    atom_tables = 0.1 * jax.random.normal(
        ks[3], (NUM_ATOM_FEATS, ATOM_VOCAB, HIDDEN), jnp.float32)
    h0 = jnp.zeros((B, N, HIDDEN), jnp.float32)
    for c in range(NUM_ATOM_FEATS):
        h0 = h0 + jnp.take(atom_tables[c], nfeats[:, :, c], axis=0)
    # input_dropout(0) is identity.

    # ---- dense structure: Ahat = I + A (SIRConv sum aggregation, fused) ----
    src_oh = jax.nn.one_hot(src, N, dtype=jnp.float32)                      # [B,E,N]
    dst_oh = jax.nn.one_hot(dst, N, dtype=jnp.float32)                      # [B,E,N]
    adj = jnp.einsum('bei,bej->bij', dst_oh, src_oh)                        # A[i,j]
    ahat = adj + jnp.eye(N, dtype=jnp.float32)[None]

    # ---- parameters ----
    sH = 1.0 / jnp.sqrt(jnp.float32(HIDDEN))
    sH2 = 1.0 / jnp.sqrt(jnp.float32(H2))
    sH4 = 1.0 / jnp.sqrt(jnp.float32(H4))
    wc = sH * jax.random.normal(ks[4], (HIDDEN, HIDDEN), jnp.float32)
    bc = 0.01 * jax.random.normal(ks[5], (HIDDEN,), jnp.float32)
    w1 = sH * jax.random.normal(ks[6], (HIDDEN, H2), jnp.float32)
    b1 = 0.01 * jax.random.normal(ks[7], (H2,), jnp.float32)
    w2 = sH2 * jax.random.normal(ks[8], (H2, H4), jnp.float32)
    b2 = 0.01 * jax.random.normal(ks[9], (H4,), jnp.float32)
    w3 = sH4 * jax.random.normal(ks[10], (H4, OUTPUT), jnp.float32)
    b3 = 0.01 * jax.random.normal(ks[11], (OUTPUT,), jnp.float32)
    # BatchNorm1d (eval mode) affine + running stats for the two hidden readout layers
    g1 = 1.0 + 0.1 * jax.random.normal(ks[12], (H2,), jnp.float32)
    be1 = 0.1 * jax.random.normal(ks[13], (H2,), jnp.float32)
    m1 = 0.1 * jax.random.normal(ks[14], (H2,), jnp.float32)
    v1 = 0.5 + jax.random.uniform(ks[15], (H2,), jnp.float32)
    g2 = 1.0 + 0.1 * jax.random.normal(ks[16], (H4,), jnp.float32)
    be2 = 0.1 * jax.random.normal(ks[17], (H4,), jnp.float32)
    m2 = 0.1 * jax.random.normal(ks[18], (H4,), jnp.float32)
    v2 = 0.5 + jax.random.uniform(ks[19], (H4,), jnp.float32)

    # fold BN into the readout linears: y = scale*(xW + b) + shift
    s1 = g1 / jnp.sqrt(v1 + 1e-5)
    w1f = w1 * s1[None, :]
    b1f = (b1 - m1) * s1 + be1
    s2 = g2 / jnp.sqrt(v2 + 1e-5)
    w2f = w2 * s2[None, :]
    b2f = (b2 - m2) * s2 + be2

    # ---- fuse graph-batches per step: sublane-stacked nodes, block-diag Ahat ----
    bf = jnp.bfloat16
    h0_step = h0.reshape(NUM_STEPS, BPS, N, HIDDEN).reshape(NUM_STEPS, NS, HIDDEN)
    ahat_r = ahat.reshape(NUM_STEPS, BPS, N, N)
    ahat_step = jnp.zeros((NUM_STEPS, NS, NS), jnp.float32)
    for bb in range(BPS):
        ahat_step = ahat_step.at[:, bb * N:(bb + 1) * N,
                                 bb * N:(bb + 1) * N].set(ahat_r[:, bb])
    # pooled row for node n (within a step) = n // n_per_g  (batch-major, graph-minor)
    node_row = jnp.arange(NS, dtype=jnp.int32) // n_per_g
    pool_rows = jax.nn.one_hot(node_row, ROWS, dtype=jnp.float32).T          # [ROWS,NS]
    pool_step = jnp.broadcast_to(pool_rows[None], (NUM_STEPS, ROWS, NS))

    # single packed per-step operand: one DMA instead of three
    slab = jnp.concatenate([h0_step, ahat_step, pool_step], axis=1).astype(bf)

    # ---- pad / pack weight operands (lane-dense, bf16 on the MXU) ----
    wc_b = wc.astype(bf)
    w1_p = jnp.zeros((HIDDEN, PAD), jnp.float32).at[:, :H2].set(w1f).astype(bf)
    w2_p = jnp.zeros((PAD, PAD), jnp.float32).at[:H2, :H4].set(w2f).astype(bf)
    w3_p = jnp.zeros((PAD, PAD), jnp.float32).at[:H4, :OUTPUT].set(w3).astype(bf)
    biases = (jnp.zeros((8, PAD), jnp.float32)
              .at[0, :HIDDEN].set(bc)
              .at[1, :H2].set(b1f)
              .at[2, :H4].set(b2f)
              .at[3, :OUTPUT].set(b3))

    out = sir_forward_pallas(slab, wc_b, w1_p, w2_p, w3_p, biases)
    out = jax.block_until_ready(out)
    assert out.shape == (B, G, OUTPUT)

    # ---- pure-JAX f32 reference on the same bf16-quantized operands ----
    def q(x):
        return x.astype(bf).astype(jnp.float32)

    def leaky(x):
        return jnp.maximum(x, LEAKY_SLOPE * x)

    pool_g = jax.nn.one_hot(graph_id, G, dtype=jnp.float32).T                # [G,N]
    h1 = leaky(jnp.einsum('bij,bjh->bih', q(ahat), q(h0)) @ q(wc) + bc[None, None, :])
    gsum = jnp.einsum('gn,bnh->bgh', pool_g, h1)
    r1 = leaky(gsum @ q(w1f) + b1f)
    r2 = leaky(r1 @ q(w2f) + b2f)
    ref = r2 @ q(w3) + b3
    assert jnp.allclose(out, ref, atol=5e-2, rtol=5e-2)

    print("KERNEL_OK")
</pallas_src>

<mosaic_0001>
module attributes {stable_mosaic.version = 11 : i64} {
  func.func @_sir_kernel(%arg0: i32, %arg1: memref<1x96x32xbf16, #tpu.memory_space<vmem>>, %arg2: memref<32x32xbf16, #tpu.memory_space<vmem>>, %arg3: memref<32x128xbf16, #tpu.memory_space<vmem>>, %arg4: memref<128x128xbf16, #tpu.memory_space<vmem>>, %arg5: memref<128x128xbf16, #tpu.memory_space<vmem>>, %arg6: memref<8x128xf32, #tpu.memory_space<vmem>>, %arg7: memref<1x32x128xf32, #tpu.memory_space<vmem>>) attributes {dimension_semantics = [#tpu.dimension_semantics<parallel>], iteration_bounds = array<i64: 2>, scalar_prefetch = 0 : i64, scratch_operands = 0 : i64, tpu.core_type = #tpu.core_type<tc>, window_params = [{transform_indices = @transform_0, window_bounds = array<i64: 1, 96, 32>}, {pipeline_mode = #tpu.pipeline_mode<synchronous>, transform_indices = @transform_1, window_bounds = array<i64: 32, 32>}, {pipeline_mode = #tpu.pipeline_mode<synchronous>, transform_indices = @transform_2, window_bounds = array<i64: 32, 128>}, {pipeline_mode = #tpu.pipeline_mode<synchronous>, transform_indices = @transform_3, window_bounds = array<i64: 128, 128>}, {pipeline_mode = #tpu.pipeline_mode<synchronous>, transform_indices = @transform_4, window_bounds = array<i64: 128, 128>}, {pipeline_mode = #tpu.pipeline_mode<synchronous>, transform_indices = @transform_5, window_bounds = array<i64: 8, 128>}, {transform_indices = @transform_6, window_bounds = array<i64: 1, 32, 128>}]} {
    %c0 = arith.constant 0 : index
    %c0_0 = arith.constant 0 : index
    %c0_1 = arith.constant 0 : index
    %0 = vector.load %arg1[%c0, %c0_0, %c0_1] : memref<1x96x32xbf16, #tpu.memory_space<vmem>>, vector<1x32x32xbf16>
    %1 = vector.shape_cast %0 : vector<1x32x32xbf16> to vector<32x32xbf16>
    %c0_2 = arith.constant 0 : index
    %c32 = arith.constant 32 : index
    %c0_3 = arith.constant 0 : index
    %2 = vector.load %arg1[%c0_2, %c32, %c0_3] : memref<1x96x32xbf16, #tpu.memory_space<vmem>>, vector<1x32x32xbf16>
    %3 = vector.shape_cast %2 : vector<1x32x32xbf16> to vector<32x32xbf16>
    %c0_4 = arith.constant 0 : index
    %c64 = arith.constant 64 : index
    %c0_5 = arith.constant 0 : index
    %4 = vector.load %arg1[%c0_4, %c64, %c0_5] : memref<1x96x32xbf16, #tpu.memory_space<vmem>>, vector<1x32x32xbf16>
    %5 = vector.shape_cast %4 : vector<1x32x32xbf16> to vector<32x32xbf16>
    %c0_6 = arith.constant 0 : index
    %c0_7 = arith.constant 0 : index
    %6 = vector.load %arg6[%c0_6, %c0_7] : memref<8x128xf32, #tpu.memory_space<vmem>>, vector<8x128xf32>
    %cst = arith.constant dense<0.000000e+00> : vector<32x32xf32>
    %7 = tpu.matmul %3, %1, %cst {dimension_numbers = #tpu.dot_dimension_numbers<[1], [0], [0], [1], [0, 0, 1, 1], [], []>} : vector<32x32xbf16>, vector<32x32xbf16>, vector<32x32xf32> -> vector<32x32xf32>
    %8 = arith.truncf %7 : vector<32x32xf32> to vector<32x32xbf16>
    %c0_8 = arith.constant 0 : index
    %c0_9 = arith.constant 0 : index
    %9 = vector.load %arg2[%c0_8, %c0_9] : memref<32x32xbf16, #tpu.memory_space<vmem>>, vector<32x32xbf16>
    %cst_10 = arith.constant dense<0.000000e+00> : vector<32x32xf32>
    %10 = tpu.matmul %8, %9, %cst_10 {dimension_numbers = #tpu.dot_dimension_numbers<[1], [0], [0], [1], [0, 0, 1, 1], [], []>} : vector<32x32xbf16>, vector<32x32xbf16>, vector<32x32xf32> -> vector<32x32xf32>
    %11 = vector.extract_strided_slice %6 {offsets = [0, 0], sizes = [1, 32], strides = [1, 1]} : vector<8x128xf32> to vector<1x32xf32>
    %12 = vector.broadcast %11 : vector<1x32xf32> to vector<32x32xf32>
    %13 = arith.addf %10, %12 : vector<32x32xf32>
    %cst_11 = arith.constant 2.000000e-01 : f32
    %14 = vector.broadcast %cst_11 : f32 to vector<32x32xf32>
    %15 = arith.mulf %14, %13 : vector<32x32xf32>
    %16 = arith.maximumf %13, %15 : vector<32x32xf32>
    %17 = arith.truncf %16 : vector<32x32xf32> to vector<32x32xbf16>
    %cst_12 = arith.constant dense<0.000000e+00> : vector<32x32xf32>
    %18 = tpu.matmul %5, %17, %cst_12 {dimension_numbers = #tpu.dot_dimension_numbers<[1], [0], [0], [1], [0, 0, 1, 1], [], []>} : vector<32x32xbf16>, vector<32x32xbf16>, vector<32x32xf32> -> vector<32x32xf32>
    %19 = arith.truncf %18 : vector<32x32xf32> to vector<32x32xbf16>
    %c0_13 = arith.constant 0 : index
    %c0_14 = arith.constant 0 : index
    %20 = vector.load %arg3[%c0_13, %c0_14] : memref<32x128xbf16, #tpu.memory_space<vmem>>, vector<32x128xbf16>
    %cst_15 = arith.constant dense<0.000000e+00> : vector<32x128xf32>
    %21 = tpu.matmul %19, %20, %cst_15 {dimension_numbers = #tpu.dot_dimension_numbers<[1], [0], [0], [1], [0, 0, 1, 1], [], []>} : vector<32x32xbf16>, vector<32x128xbf16>, vector<32x128xf32> -> vector<32x128xf32>
    %22 = vector.extract_strided_slice %6 {offsets = [1, 0], sizes = [1, 128], strides = [1, 1]} : vector<8x128xf32> to vector<1x128xf32>
    %23 = vector.broadcast %22 : vector<1x128xf32> to vector<32x128xf32>
    %24 = arith.addf %21, %23 : vector<32x128xf32>
    %cst_16 = arith.constant 2.000000e-01 : f32
    %25 = vector.broadcast %cst_16 : f32 to vector<32x128xf32>
    %26 = arith.mulf %25, %24 : vector<32x128xf32>
    %27 = arith.maximumf %24, %26 : vector<32x128xf32>
    %28 = arith.truncf %27 : vector<32x128xf32> to vector<32x128xbf16>
    %c0_17 = arith.constant 0 : index
    %c0_18 = arith.constant 0 : index
    %29 = vector.load %arg4[%c0_17, %c0_18] : memref<128x128xbf16, #tpu.memory_space<vmem>>, vector<128x128xbf16>
    %cst_19 = arith.constant dense<0.000000e+00> : vector<32x128xf32>
    %30 = tpu.matmul %28, %29, %cst_19 {dimension_numbers = #tpu.dot_dimension_numbers<[1], [0], [0], [1], [0, 0, 1, 1], [], []>} : vector<32x128xbf16>, vector<128x128xbf16>, vector<32x128xf32> -> vector<32x128xf32>
    %31 = vector.extract_strided_slice %6 {offsets = [2, 0], sizes = [1, 128], strides = [1, 1]} : vector<8x128xf32> to vector<1x128xf32>
    %32 = vector.broadcast %31 : vector<1x128xf32> to vector<32x128xf32>
    %33 = arith.addf %30, %32 : vector<32x128xf32>
    %cst_20 = arith.constant 2.000000e-01 : f32
    %34 = vector.broadcast %cst_20 : f32 to vector<32x128xf32>
    %35 = arith.mulf %34, %33 : vector<32x128xf32>
    %36 = arith.maximumf %33, %35 : vector<32x128xf32>
    %37 = arith.truncf %36 : vector<32x128xf32> to vector<32x128xbf16>
    %c0_21 = arith.constant 0 : index
    %c0_22 = arith.constant 0 : index
    %38 = vector.load %arg5[%c0_21, %c0_22] : memref<128x128xbf16, #tpu.memory_space<vmem>>, vector<128x128xbf16>
    %cst_23 = arith.constant dense<0.000000e+00> : vector<32x128xf32>
    %39 = tpu.matmul %37, %38, %cst_23 {dimension_numbers = #tpu.dot_dimension_numbers<[1], [0], [0], [1], [0, 0, 1, 1], [], []>} : vector<32x128xbf16>, vector<128x128xbf16>, vector<32x128xf32> -> vector<32x128xf32>
    %40 = vector.extract_strided_slice %6 {offsets = [3, 0], sizes = [1, 128], strides = [1, 1]} : vector<8x128xf32> to vector<1x128xf32>
    %41 = vector.broadcast %40 : vector<1x128xf32> to vector<32x128xf32>
    %42 = arith.addf %39, %41 : vector<32x128xf32>
    %c0_24 = arith.constant 0 : index
    %c0_25 = arith.constant 0 : index
    %c0_26 = arith.constant 0 : index
    %43 = vector.load %arg7[%c0_24, %c0_25, %c0_26] : memref<1x32x128xf32, #tpu.memory_space<vmem>>, vector<1x32x128xf32>
    %44 = vector.shape_cast %43 : vector<1x32x128xf32> to vector<32x128xf32>
    %45 = vector.shape_cast %42 : vector<32x128xf32> to vector<1x32x128xf32>
    tpu.vector_store %arg7[%c0_24, %c0_25, %c0_26], %45 {strides = array<i32>} : memref<1x32x128xf32, #tpu.memory_space<vmem>>, vector<1x32x128xf32>,
    return
  }
  func.func @transform_0(%arg0: i32) -> (i32, i32, i32) {
    %c0_i32 = arith.constant 0 : i32
    %c0_i32_0 = arith.constant 0 : i32
    %c0_i32_1 = arith.constant 0 : i32
    return %arg0, %c0_i32, %c0_i32_0 : i32, i32, i32
  }
  func.func @transform_1(%arg0: i32) -> (i32, i32) {
    %c0_i32 = arith.constant 0 : i32
    %c0_i32_0 = arith.constant 0 : i32
    %c0_i32_1 = arith.constant 0 : i32
    return %c0_i32, %c0_i32_0 : i32, i32
  }
  func.func @transform_2(%arg0: i32) -> (i32, i32) {
    %c0_i32 = arith.constant 0 : i32
    %c0_i32_0 = arith.constant 0 : i32
    %c0_i32_1 = arith.constant 0 : i32
    return %c0_i32, %c0_i32_0 : i32, i32
  }
  func.func @transform_3(%arg0: i32) -> (i32, i32) {
    %c0_i32 = arith.constant 0 : i32
    %c0_i32_0 = arith.constant 0 : i32
    %c0_i32_1 = arith.constant 0 : i32
    return %c0_i32, %c0_i32_0 : i32, i32
  }
  func.func @transform_4(%arg0: i32) -> (i32, i32) {
    %c0_i32 = arith.constant 0 : i32
    %c0_i32_0 = arith.constant 0 : i32
    %c0_i32_1 = arith.constant 0 : i32
    return %c0_i32, %c0_i32_0 : i32, i32
  }
  func.func @transform_5(%arg0: i32) -> (i32, i32) {
    %c0_i32 = arith.constant 0 : i32
    %c0_i32_0 = arith.constant 0 : i32
    %c0_i32_1 = arith.constant 0 : i32
    return %c0_i32, %c0_i32_0 : i32, i32
  }
  func.func @transform_6(%arg0: i32) -> (i32, i32, i32) {
    %c0_i32 = arith.constant 0 : i32
    %c0_i32_0 = arith.constant 0 : i32
    %c0_i32_1 = arith.constant 0 : i32
    return %arg0, %c0_i32, %c0_i32_0 : i32, i32, i32
  }
}

</mosaic_0001>

<bundles_post_ra>
// kernel: tpu_custom_call.1
= control target key start
LH: loop header
LB: loop body
LE: loop exit
PB: predicated region body
PF: predicated region fallthrough
CT: control target
= control target key end

     0   :  { %11 = vsyncpa [#allocation3], 0  ;;  %s1438_s0 = inlined_call_operand.vmem [shape: bf16[2,96,32], index: 0, kind: input, shape index: {}]   ;;  %s1439_s1 = inlined_call_operand.hbm [shape: bf16[32,32], index: 1, kind: input, shape index: {}]   ;;  %s1440_s2 = inlined_call_operand.hbm [shape: bf16[32,128], index: 2, kind: input, shape index: {}]   ;;  %s1441_s3 = inlined_call_operand.vmem [shape: bf16[128,128], index: 3, kind: input, shape index: {}]   ;;  %s1442_s4 = inlined_call_operand.vmem [shape: bf16[128,128], index: 4, kind: input, shape index: {}]   ;;  %s1443_s5 = inlined_call_operand.hbm [shape: f32[8,128], index: 5, kind: input, shape index: {}]   ;;  %s1444_s6 = inlined_call_operand.hbm [shape: f32[2,32,128], index: 6, kind: output, shape index: {}]  }
   0x1   :  { %12 = vsyncpa [#allocation6], 0 }
   0x2   :  { %13 = vsyncpa [#allocation4], 0 }
   0x3   :  { %15 = vsyncpa [#allocation4 + $0x1], 0  ;;  %s1245_s21 = smov 0   ;;  %s1247_s22 = smov 0  }
   0x4   :  { %s1249_s23 = smov 0   ;;  %s1251_s24 = smov 0  }
   0x5 LB: > { %s1266_s25 = sadd.s32 4294967295, %s1201_s24   ;;  %s794_s26 = sadd.s32 4294967294, %s1201_s24   ;;  %s1201_s24 = sphi %s1251_s24, %s1452_s24   ;;  %s1197_s23 = sphi %s1249_s23, %s1451_s23   ;;  %s1193_s22 = sphi %s1247_s22, %s1450_s22   ;;  %s1189_s21 = sphi %s1245_s21, %s1449_s21  }
   0x6   : > { %s1270_s27 = sadd.s32 1, %s1201_s24   ;;  %s159_s28 = sadd.s32 1, %s1197_s23 }
   0x7   : > { %s156_s29 = ssub.s32 %s1201_s24, %s1270_s27  ;;  %p169_p0 = scmp.ne.s32.totalorder %s1197_s23, %s1193_s22 }
   0x8   : > { %p157_p1 = scmp.eq.s32.totalorder %s156_s29, 0  ;;  %p170_p2 = scmp.eq.s32.totalorder %s1266_s25, 1 }
   0x9   : > { %p175_p3 = scmp.ne.s32.totalorder %s1193_s22, %s1189_s21  ;;  %p176_p4 = scmp.eq.s32.totalorder %s794_s26, 1 }
   0xa   : > { %s1281_s30 = scalar_select %p157_p1, %s1197_s23, %s159_s28  }
   0xb   : > { %p1283_p5 = por %p170_p2, %p169_p0  ;;  %p1287_p6 = por %p176_p4, %p175_p3 }
   0xc   : > { %p795_p7 = scmp.ge.s32.totalorder %s1201_s24, 1  ;;  %p183_p8 = scmp.lt.s32.totalorder %s1201_s24, 3 }
   0xd   : > { %p995_p9 = scmp.eq.s32.totalorder %s1266_s25, 0  ;;  %s208_s12 = sshll.u32 %s1440_s2, 4  ;;  %s209_s12 = int_to_ptr.hbm [resolvable:$true] %s208_s12 }
   0xe   : > { %p1294_p10 = pnand %p795_p7, %p183_p8  ;;  %s194_s15 = sshll.u32 %s1439_s1, 4  ;;  %s195_s15 = int_to_ptr.hbm [resolvable:$true] %s194_s15 }
   0xf   : > { %s1203_s17 = smov [#allocation5]   ;;  %s1204_s19 = smov 64  }
  0x10   : > { %p981_p11 = pneg %p1294_p10  ;;  %s210_s18 = sshll.u32 %s1203_s17, 4  ;;  %s211_s18 = int_to_ptr.vmem [resolvable:$true] %s210_s18 }
  0x11   : > { %s1205_s20 = smov 4   ;;  %s1206_s26 = smov [#allocation2]  }
  0x12   : > { %p1308_p12 = pnand %p995_p9, %p981_p11  ;;  %s196_s28 = sshll.u32 %s1206_s26, 4  ;;  %s197_s28 = int_to_ptr.vmem [resolvable:$true] %s196_s28 }
  0x13   : > { %s229_s11 = sshll.u32 %s1443_s5, 4  ;;  %s1207_s13 = smov [#allocation7]   ;;  %s230_s11 = int_to_ptr.hbm [resolvable:$true] %s229_s11 }
  0x14   : > { %987 = dma.hbm_to_vmem [thread:$0]  (!%p1308_p12), %s209_s12, 256, %s211_s18, [#allocation6], %s1204_s19, %s1204_s19, %s1205_s20  }
  0x15   : > { %984 = dma.hbm_to_vmem [thread:$0]  (!%p1308_p12), %s195_s15, 256, %s197_s28, [#allocation3], %s1204_s19, %s1204_s19, %s1205_s20  }
  0x16   : > { %s231_s14 = sshll.u32 %s1207_s13, 4  ;;  %252 = sbr.rel (%p1294_p10) target bundleno = 946 (0x3b2), region = 44  ;;  %s232_s14 = int_to_ptr.vmem [resolvable:$true] %s231_s14 }
  0x17   : > { %990 = dma.hbm_to_vmem [thread:$0]  (!%p1308_p12), %s230_s11, 128, %s232_s14, [#allocation6]  }
  0x1b   : > { %1176 = dma.done.wait (%p995_p9), [#allocation3], 256  }
  0x1c   : > { %1178 = vsyncadd (%p995_p9), [#allocation3], 4294967040 }
  0x1d   : > { %1180 = dma.done.wait (%p995_p9), [#allocation6], 384  }
  0x1e   : > { %1182 = vsyncadd (%p995_p9), [#allocation6], 4294966912  ;;  %p293_p13 = scmp.lt.s32.totalorder %s1266_s25, 1  ;;  %vm334_vm0 = vcmask 261120   ;;  %v930_v4 = vld [vmem:[#allocation2 + $0x8] sm:$0xff]  ;;  %v929_v5 = vld [vmem:[#allocation2] sm:$0xff] }
  0x1f   : > { %391 = vmatpush.bf16.msra.mxu1 %v930_v4  ;;  %v1346_v14 = vld [vmem:[#allocation7] sm:$0xff]  ;;  %v932_v34 = vld [vmem:[#allocation5 + $0x8] sm:$0xff]  ;;  %v931_v35 = vld [vmem:[#allocation5] sm:$0xff]  ;;  %s290_s20 = sand.u32 1, %s1193_s22   ;;  %s949_s29 = sshll.u32 %s1266_s25, 5 }
  0x20   : > { %s294_s12 = scalar_select %p293_p13, %s1266_s25, 1  ;;  %v366_v16 = vperm.slane %v1346_v14, 0  ;;  %480 = vmatpush.bf16.msra.mxu3 %v932_v34  ;;  %v940_v36 = vld [vmem:[%s1441_s3 + $0x38] sm:$0xff]  ;;  %v939_v37 = vld [vmem:[%s1441_s3 + $0x30] sm:$0xff]  ;;  %v938_v39 = vld [vmem:[%s1441_s3 + $0x28] sm:$0xff]  ;;  %v455_v51 = vperm.slane %v1346_v14, 1 }
  0x21   : > { %v937_v40 = vld [vmem:[%s1441_s3 + $0x20] sm:$0xff]  ;;  %v936_v46 = vld [vmem:[%s1441_s3 + $0x18] sm:$0xff]  ;;  %v935_v47 = vld [vmem:[%s1441_s3 + $0x10] sm:$0xff]  ;;  %s804_s26 = sshll.u32 %s290_s20, 5  ;;  %s697_s13 = scalar_lea.hbm %s1444_s6, %s949_s29 }
  0x22   : > { %s966_s15 = smul.u32 48, %s294_s12  ;;  %v934_v48 = vld [vmem:[%s1441_s3 + $0x8] sm:$0xff]  ;;  %v933_v49 = vld [vmem:[%s1441_s3] sm:$0xff]  ;;  %v948_v52 = vld [vmem:[%s1442_s4 + $0x38] sm:$0xff]  ;;  %s292_s28 = scalar_lea.vmem [#allocation8], %s804_s26 }
  0x23   : > { %392 = vmatpush.bf16.msra.mxu1 %v929_v5  ;;  %v947_v53 = vld [vmem:[%s1442_s4 + $0x30] sm:$0xff]  ;;  %v946_v55 = vld [vmem:[%s1442_s4 + $0x28] sm:$0xff]  ;;  %v945_v60 = vld [vmem:[%s1442_s4 + $0x20] sm:$0xff]  ;;  %s698_s14 = sshll.u32 %s292_s28, 4  ;;  %s700_s12 = sshll.u32 %s697_s13, 4  ;;  %s699_s14 = int_to_ptr.vmem [resolvable:$true] %s698_s14  ;;  %s701_s12 = int_to_ptr.hbm [resolvable:$true] %s700_s12 }
  0x24   : > { %s1336_s17 = scalar_lea.vmem %s1438_s0, %s966_s15  ;;  %481 = vmatpush.bf16.msra.mxu3 %v931_v35  ;;  %s686_s15 = scalar_lea.sflag [#allocation4], %s290_s20 }
  0x25   : > { %v924_v0 = vld [vmem:[%s1336_s17 + $0x8] sm:$0xff]  ;;  %v923_v1 = vld [vmem:[%s1336_s17] sm:$0xff]  ;;  %v925_v2 = vld [vmem:[%s1336_s17 + $0x10] sm:$0xff]  ;;  %s1145_s16 = sshra.s32 %s701_s12, 4  ;;  %s1151_s18 = scalar_lea.hbm %s1444_s6, 64  ;;  %s1146_s16 = int_to_ptr.hbm [resolvable:$true] %s1145_s16 }
  0x26   : > { %347 = vmatpush.bf16.msra.mxu0 %v924_v0  ;;  %v926_v3 = vld [vmem:[%s1336_s17 + $0x18] sm:$0xff]  ;;  %v927_v32 = vld [vmem:[%s1336_s17 + $0x20] sm:$0xff]  ;;  %v928_v33 = vld [vmem:[%s1336_s17 + $0x28] sm:$0xff]  ;;  %s1147_s9 = scalar_lea.hbm %s1146_s16, 32  ;;  %p1152_p3 = scmp.lt.s32.totalorder %s1146_s16, %s1444_s6 }
  0x27   : > { %662 = vmatpush.bf16.msrb.mxu1 %v948_v52  ;;  %p1148_p0 = scmp.ne.s32.totalorder %s1146_s16, %s1147_s9  ;;  %p1153_p4 = scmp.lt.s32.totalorder %s1151_s18, %s1147_s9 }
  0x28   : > { %958 = vmatpush.bf16.msrb.mxu3 %v948_v52 }
  0x29   : > { %p1149_p1 = pnand %p1148_p0, %p1283_p5  ;;  %p1154_p7 = por %p1153_p4, %p1152_p3 }
  0x2a   : > { %348 = vmatpush.bf16.msra.mxu0 %v923_v1 }
  0x2b   : > { %663 = vmatpush.bf16.msrb.mxu1 %v947_v53  ;;  %p1150_p2 = pneg %p1149_p1 }
  0x2c   : > { %959 = vmatpush.bf16.msrb.mxu3 %v947_v53 }
  0x2d   : > { %822 = vmatmul.msk.bf16.vlgmr.msra.gmra.mxu0 %vm334_vm0, %v925_v2  ;;  %p1155_p8 = pnand %p1154_p7, %p1150_p2 }
  0x2e   : > { %568 = vmatpush.bf16.msrb.mxu0 %v940_v36 }
  0x2f   : > { %664 = vmatpush.bf16.msrb.mxu1 %v946_v55 }
  0x30   : > { %960 = vmatpush.bf16.msrb.mxu3 %v946_v55 }
  0x32   : > { %569 = vmatpush.bf16.msrb.mxu0 %v939_v37 }
  0x33   : > { %665 = vmatpush.bf16.msrb.mxu1 %v945_v60 }
  0x34   : > { %961 = vmatpush.bf16.msrb.mxu3 %v945_v60 }
  0x36   : > { %570 = vmatpush.bf16.msrb.mxu0 %v938_v39 }
  0x3a   : > { %571 = vmatpush.bf16.msrb.mxu0 %v937_v40 }
  0x3d   : > { %823 = vmatmul.msk.bf16.gmra.mxu0 %vm334_vm0, %v926_v3 }
  0x3e   : > { %572 = vmatpush.bf16.msrb.mxu0 %v936_v46 }
  0x42   : > { %573 = vmatpush.bf16.msrb.mxu0 %v935_v47 }
  0x46   : > { %574 = vmatpush.bf16.msrb.mxu0 %v934_v48 }
  0x4a   : > { %575 = vmatpush.bf16.msrb.mxu0 %v933_v49 }
  0xaa   : > { %v350_v6 = vpop.f32.mrf.mxu0 }
  0xb2   : > { %v352_v7 = vpop.f32.mrf.mxu0 }
  0xb3   : > { %v360_v8 = vpack.c.bf16 %v352_v7, %v350_v6 }
  0xb5   : > { %832 = vmatmul.msk.bf16.vlgmr.msra.gmra.mxu1 %vm334_vm0, %v360_v8 }
  0xba   : > { %v355_v9 = vpop.f32.mrf.mxu0 }
  0xc2   : > { %v357_v10 = vpop.f32.mrf.mxu0 }
  0xc3   : > { %v361_v11 = vpack.c.bf16 %v357_v10, %v355_v9  ;;  %v944_v9 = vld [vmem:[%s1442_s4 + $0x18] sm:$0xff]  ;;  %v943_v10 = vld [vmem:[%s1442_s4 + $0x10] sm:$0xff] }
  0xc4   : > { %666 = vmatpush.bf16.msrb.mxu1 %v944_v9  ;;  %962 = vmatpush.bf16.msrb.mxu3 %v944_v9 }
  0xc5   : > { %833 = vmatmul.msk.bf16.gmra.mxu1 %vm334_vm0, %v361_v11  ;;  %v942_v11 = vld [vmem:[%s1442_s4 + $0x8] sm:$0xff] }
  0xc8   : > { %667 = vmatpush.bf16.msrb.mxu1 %v943_v10  ;;  %963 = vmatpush.bf16.msrb.mxu3 %v943_v10 }
  0xcc   : > { %668 = vmatpush.bf16.msrb.mxu1 %v942_v11  ;;  %964 = vmatpush.bf16.msrb.mxu3 %v942_v11 }
 0x132   : > { %v394_v12 = vpop.f32.mrf.mxu1 }
 0x133   : > { %v395_v20 = vadd.f32 %v394_v12, %v366_v16  ;;  %v941_v12 = vld [vmem:[%s1442_s4] sm:$0xff] }
 0x134   : > { %669 = vmatpush.bf16.msrb.mxu1 %v941_v12  ;;  %965 = vmatpush.bf16.msrb.mxu3 %v941_v12 }
 0x135   : > { %v404_v25 = vmul.f32 0.2, %v395_v20 }
 0x137   : > { %v408_v30 = vmax.f32 %v395_v20, %v404_v25 }
 0x13a   : > { %v396_v13 = vpop.f32.mrf.mxu1 }
 0x13b   : > { %v397_v18 = vadd.f32 %v396_v13, %v366_v16 }
 0x13d   : > { %v405_v23 = vmul.f32 0.2, %v397_v18 }
 0x13f   : > { %v409_v28 = vmax.f32 %v397_v18, %v405_v23 }
 0x141   : > { %v412_v31 = vpack.c.bf16 %v409_v28, %v408_v30 }
 0x142   : > { %v399_v15 = vpop.f32.mrf.mxu1 }
 0x143   : > { %v400_v17 = vadd.f32 %v399_v15, %v366_v16  ;;  %v519_v15 = vperm.slane %v1346_v14, 2 }
 0x145   : > { %v406_v21 = vmul.f32 0.2, %v400_v17 }
 0x147   : > { %v410_v26 = vmax.f32 %v400_v17, %v406_v21 }
 0x14a   : > { %v401_v19 = vpop.f32.mrf.mxu1 }
 0x14b   : > { %v402_v22 = vadd.f32 %v401_v19, %v366_v16 }
 0x14d   : > { %v407_v24 = vmul.f32 0.2, %v402_v22 }
 0x14f   : > { %v411_v27 = vmax.f32 %v402_v22, %v407_v24 }
 0x151   : > { %v413_v29 = vpack.c.bf16 %v411_v27, %v410_v26 }
 0x153   : > { %436 = vmatpush.bf16.msra.mxu2 %v413_v29 }
 0x157   : > { %437 = vmatpush.bf16.msra.mxu2 %v412_v31 }
 0x15a   : > { %842 = vmatmul.msk.bf16.vlgmr.msra.gmra.mxu2 %vm334_vm0, %v927_v32 }
 0x15b   : > { %950 = vmatpush.bf16.msrb.mxu2 %v940_v36 }
 0x15f   : > { %951 = vmatpush.bf16.msrb.mxu2 %v939_v37 }
 0x163   : > { %952 = vmatpush.bf16.msrb.mxu2 %v938_v39 }
 0x167   : > { %953 = vmatpush.bf16.msrb.mxu2 %v937_v40 }
 0x16a   : > { %843 = vmatmul.msk.bf16.gmra.mxu2 %vm334_vm0, %v928_v33  ;;  %v613_v33 = vperm.slane %v1346_v14, 3 }
 0x16b   : > { %954 = vmatpush.bf16.msrb.mxu2 %v936_v46 }
 0x16f   : > { %955 = vmatpush.bf16.msrb.mxu2 %v935_v47 }
 0x173   : > { %956 = vmatpush.bf16.msrb.mxu2 %v934_v48 }
 0x177   : > { %957 = vmatpush.bf16.msrb.mxu2 %v933_v49 }
 0x1dd   : > { %v439_v38 = vpop.f32.mrf.mxu2 }
 0x1e5   : > { %v441_v41 = vpop.f32.mrf.mxu2 }
 0x1e6   : > { %v449_v42 = vpack.c.bf16 %v441_v41, %v439_v38 }
 0x1e8   : > { %852 = vmatmul.msk.bf16.vlgmr.msra.gmra.mxu3 %vm334_vm0, %v449_v42 }
 0x1ed   : > { %v444_v43 = vpop.f32.mrf.mxu2 }
 0x1f5   : > { %v446_v44 = vpop.f32.mrf.mxu2 }
 0x1f6   : > { %v450_v45 = vpack.c.bf16 %v446_v44, %v444_v43 }
 0x1f8   : > { %853 = vmatmul.msk.bf16.gmra.mxu3 %vm334_vm0, %v450_v45 }
 0x26b   : > { %v483_v50 = vpop.f32.mrf.mxu3 }
 0x26c   : > { %v484_v54 = vadd.f32 %v483_v50, %v455_v51 }
 0x26e   : > { %v493_v57 = vmul.f32 0.2, %v484_v54 }
 0x270   : > { %v497_v61 = vmax.f32 %v484_v54, %v493_v57 }
 0x273   : > { %v485_v56 = vpop.f32.mrf.mxu3 }
 0x274   : > { %v486_v58 = vadd.f32 %v485_v56, %v455_v51 }
 0x276   : > { %v494_v59 = vmul.f32 0.2, %v486_v58 }
 0x278   : > { %v498_v62 = vmax.f32 %v486_v58, %v494_v59 }
 0x27a   : > { %v501_v63 = vpack.c.bf16 %v498_v62, %v497_v61 }
 0x27b   : > { %v488_v0 = vpop.f32.mrf.mxu3 }
 0x27c   : > { %576 = vmatmul.bf16.vlgmr.msrb.gmra.mxu0 %v501_v63  ;;  %v489_v1 = vadd.f32 %v488_v0, %v455_v51 }
 0x27e   : > { %v495_v3 = vmul.f32 0.2, %v489_v1 }
 0x280   : > { %v499_v6 = vmax.f32 %v489_v1, %v495_v3 }
 0x283   : > { %v490_v2 = vpop.f32.mrf.mxu3 }
 0x284   : > { %v491_v4 = vadd.f32 %v490_v2, %v455_v51 }
 0x286   : > { %v496_v5 = vmul.f32 0.2, %v491_v4 }
 0x288   : > { %v500_v7 = vmax.f32 %v491_v4, %v496_v5 }
 0x28a   : > { %v502_v8 = vpack.c.bf16 %v500_v7, %v499_v6 }
 0x28c   : > { %581 = vmatmul.bf16.vlgmr.msrb.gmra.mxu2 %v502_v8 }
 0x2f9   : > { %v577_v13 = vpop.f32.mrf.mxu0 }
 0x2fa   : > { %v578_v16 = vadd.f32 %v577_v13, %v519_v15 }
 0x2fc   : > { %v587_v18 = vmul.f32 0.2, %v578_v16 }
 0x2fe   : > { %v591_v21 = vmax.f32 %v578_v16, %v587_v18 }
 0x301   : > { %v579_v17 = vpop.f32.mrf.mxu0 }
 0x302   : > { %v580_v19 = vadd.f32 %v579_v17, %v519_v15 }
 0x304   : > { %v588_v20 = vmul.f32 0.2, %v580_v19 }
 0x306   : > { %v592_v22 = vmax.f32 %v580_v19, %v588_v20 }
 0x308   : > { %v595_v23 = vpack.c.bf16 %v592_v22, %v591_v21 }
 0x30a   : > { %670 = vmatmul.bf16.vlgmr.msrb.gmra.mxu1 %v595_v23 }
 0x30f   : > { %v582_v24 = vpop.f32.mrf.mxu2 }
 0x310   : > { %v583_v25 = vadd.f32 %v582_v24, %v519_v15 }
 0x312   : > { %v589_v27 = vmul.f32 0.2, %v583_v25 }
 0x314   : > { %v593_v30 = vmax.f32 %v583_v25, %v589_v27 }
 0x317   : > { %v584_v26 = vpop.f32.mrf.mxu2 }
 0x318   : > { %v585_v28 = vadd.f32 %v584_v26, %v519_v15 }
 0x31a   : > { %v590_v29 = vmul.f32 0.2, %v585_v28 }
 0x31c   : > { %v594_v31 = vmax.f32 %v585_v28, %v590_v29 }
 0x31e   : > { %v596_v32 = vpack.c.bf16 %v594_v31, %v593_v30 }
 0x320   : > { %675 = vmatmul.bf16.vlgmr.msrb.gmra.mxu3 %v596_v32 }
 0x387   : > { %v671_v34 = vpop.f32.mrf.mxu1 }
 0x388   : > { %v672_v35 = vadd.f32 %v671_v34, %v613_v33 }
 0x38a   : > { %681 = vst [vmem:[%s292_s28] sm:$0xff] %v672_v35 }
 0x38f   : > { %v673_v36 = vpop.f32.mrf.mxu1 }
 0x390   : > { %v674_v37 = vadd.f32 %v673_v36, %v613_v33 }
 0x392   : > { %682 = vst [vmem:[%s292_s28 + $0x8] sm:$0xff] %v674_v37 }
 0x3a3   : > { %v676_v38 = vpop.f32.mrf.mxu3 }
 0x3a4   : > { %v677_v39 = vadd.f32 %v676_v38, %v613_v33 }
 0x3a6   : > { %683 = vst [vmem:[%s292_s28 + $0x10] sm:$0xff] %v677_v39 }
 0x3ab   : > { %v678_v14 = vpop.f32.mrf.mxu3 }
 0x3ac   : > { %v679_v40 = vadd.f32 %v678_v14, %v613_v33 }
 0x3ae   : > { %684 = vst [vmem:[%s292_s28 + $0x18] sm:$0xff] %v679_v40 }
 0x3af   : > { %1158 = shalt.err (!%p1155_p8)
}
 0x3b0   : > { %s1208_s20 = smov 128   ;;  %s1209_s28 = smov 8  }
 0x3b1   : > { %979 = dma.vmem_to_hbm [thread:$0]  (%p1283_p5), %s699_s14, 512, %s701_s12, %s686_s15, %s1208_s20, %s1208_s20, %s1209_s28  }
 0x3b2 PF: > { %p1001_p9 = scmp.ge.s32.totalorder %s1201_s24, 2  ;;  %s715_s29 = sand.u32 1, %s1189_s21  }
 0x3b3   : > { %s716_s10 = scalar_lea.sflag [#allocation4], %s715_s29 }
 0x3b4   : > { %p992_p10 = pnand %p1001_p9, %p1287_p6 }
 0x3b6   : > { %p993_p11 = pneg %p992_p10 }
 0x3b8   : > { %1184 = dma.done.wait (%p993_p11), %s716_s10, 512  }
 0x3b9   : > { %1186 = vsyncadd (%p993_p11), %s716_s10, 4294966784  ;;  %p18_p12 = scmp.ge.s32.totalorder %s1270_s27, 4   ;;  %s1449_s21 = smov %s1193_s22 }
 0x3ba   : > { %s1450_s22 = smov %s1197_s23  ;;  %s1451_s23 = smov %s1281_s30 }
 0x3bb   : > { %s1452_s24 = smov %s1270_s27  ;;  %20 = sbr.rel (!%p18_p12) target bundleno = 5 (0x5), region = 92 }
 0x3c0   :  { %722 = vsyncpa [#allocation3], 1 }
 0x3c1   :  { %724 = vsyncpa [#allocation3 + $0x1], 1 }
 0x3c2   :  { %725 = vsyncpa [#allocation6], 1 }
 0x3c3   :  { %726 = vsyncpa [#allocation4], 1 }
 0x3c4   :  { %728 = vsyncpa [#allocation4 + $0x1], 1 }

</bundles_post_ra>
